<compile_context>
chip_gen: v7x
topology: tpu7x:2x2x1
jax: 0.10.0
libtpu: 0.0.40
codegen_flags: <defaults>
</compile_context>

<pallas_src>
import jax
import jax.numpy as jnp
from jax.experimental import pallas as pl
from jax.experimental.pallas import tpu as pltpu

F_IN = 100
H1, H2, OUT = 64, 32, 2
DEFAULT_TB = 4096  # x tile @ 4096 rows = 4096*100*4B ~= 1.6 MiB, 2x-buffered ~3.2 MiB


def _round_up(n, m):
    return ((n + m - 1) // m) * m


def _mlp_softmax_kernel(x_ref, w1_ref, b1_ref, w2_ref, b2_ref, w3_ref, b3_ref, o_ref):
    x = x_ref[...]                                                    # [TB, 100] f32

    # Layer 1: Linear(100 -> 64) + ReLU  (K=100 handled directly by Mosaic)
    h1 = jnp.dot(x, w1_ref[...], preferred_element_type=jnp.float32) + b1_ref[...]
    h1 = jnp.maximum(h1, 0.0)

    # Layer 2: Linear(64 -> 32) + ReLU
    h2 = jnp.dot(h1, w2_ref[...], preferred_element_type=jnp.float32) + b2_ref[...]
    h2 = jnp.maximum(h2, 0.0)

    # Layer 3: Linear(32 -> 2)
    logits = jnp.dot(h2, w3_ref[...], preferred_element_type=jnp.float32) + b3_ref[...]

    # 2-class row softmax in closed form: p0 = sigmoid(z0 - z1), p1 = 1 - p0.
    # Numerically stable, no cross-lane reduction, rows sum to exactly 1.
    d = logits[:, 0:1] - logits[:, 1:2]                               # [TB, 1]
    e = jnp.exp(-jnp.abs(d))                                          # in (0, 1]
    inv = 1.0 / (1.0 + e)                                             # sigmoid(|d|)
    p0 = jnp.where(d >= 0.0, inv, 1.0 - inv)
    o_ref[...] = jnp.concatenate([p0, 1.0 - p0], axis=-1)             # [TB, 2]


def adult_model_forward(x, params, *, block_b=DEFAULT_TB):
    """x: [B, 100] f32; params: (w1[100,64], b1[1,64], w2[64,32], b2[1,32], w3[32,2], b3[1,2])."""
    w1, b1, w2, b2, w3, b3 = params
    B, F = x.shape
    assert F == F_IN

    # Batch tile: multiple of 8 (sublane); capped so the grid has >= 2 steps
    # whenever B allows it (keeps both v7x TensorCores busy via "parallel").
    tb = min(block_b, max(8, _round_up(-(-B // 2), 8)))
    grid = (pl.cdiv(B, tb),)  # ragged last tile handled by Pallas' masked writes

    const = lambda a: pl.BlockSpec(a.shape, lambda i: (0, 0))

    return pl.pallas_call(
        _mlp_softmax_kernel,
        out_shape=jax.ShapeDtypeStruct((B, OUT), jnp.float32),
        grid_spec=pltpu.PrefetchScalarGridSpec(
            num_scalar_prefetch=0,
            grid=grid,
            in_specs=[
                pl.BlockSpec((tb, F_IN), lambda i: (i, 0)),
                const(w1), const(b1), const(w2), const(b2), const(w3), const(b3),
            ],
            out_specs=pl.BlockSpec((tb, OUT), lambda i: (i, 0)),
        ),
        compiler_params=pltpu.CompilerParams(
            dimension_semantics=("parallel",),
            vmem_limit_bytes=32 * 1024 * 1024,  # re-derived against v7x's 64 MiB VMEM
        ),
    )(x, w1, b1, w2, b2, w3, b3)


def init_params(key):
    """Deterministic init with the shapes implied by the PyTorch module."""
    ks = jax.random.split(key, 6)

    def linear(kw, kb, fan_in, fan_out):
        bound = 1.0 / jnp.sqrt(float(fan_in))
        w = jax.random.uniform(kw, (fan_in, fan_out), jnp.float32, -bound, bound)
        b = jax.random.uniform(kb, (1, fan_out), jnp.float32, -bound, bound)
        return w, b

    w1, b1 = linear(ks[0], ks[1], F_IN, H1)
    w2, b2 = linear(ks[2], ks[3], H1, H2)
    w3, b3 = linear(ks[4], ks[5], H2, OUT)
    return (w1, b1, w2, b2, w3, b3)


def _reference_forward(x, params):
    w1, b1, w2, b2, w3, b3 = params
    h1 = jnp.maximum(x @ w1 + b1, 0.0)
    h2 = jnp.maximum(h1 @ w2 + b2, 0.0)
    logits = h2 @ w3 + b3
    return jax.nn.softmax(logits, axis=-1)


if __name__ == "__main__":
    key = jax.random.PRNGKey(0)
    k_x, k_p, k_x2 = jax.random.split(key, 3)
    params = init_params(k_p)

    # Primary small-shape run.
    B = 8
    x = jax.random.normal(k_x, (B, F_IN), dtype=jnp.float32)
    out = jax.block_until_ready(adult_model_forward(x, params))

    assert out.shape == (B, OUT)
    # Closed-form 2-class softmax sums to 1 exactly (up to f32 rounding).
    assert bool(jnp.all(jnp.abs(jnp.sum(out, axis=-1) - 1.0) < 1e-6))
    ref = _reference_forward(x, params)
    assert bool(jnp.max(jnp.abs(out - ref)) < 1e-5)

    # Ragged-batch check: exercises the cdiv grid + masked write of the last tile.
    B2 = 13
    x2 = jax.random.normal(k_x2, (B2, F_IN), dtype=jnp.float32)
    out2 = jax.block_until_ready(adult_model_forward(x2, params))
    assert out2.shape == (B2, OUT)
    ref2 = _reference_forward(x2, params)
    assert bool(jnp.max(jnp.abs(out2 - ref2)) < 1e-5)

    print("KERNEL_OK")
</pallas_src>

<mosaic_0001>
module attributes {stable_mosaic.version = 11 : i64} {
  func.func @_mlp_softmax_kernel(%arg0: i32, %arg1: memref<8x100xf32, #tpu.memory_space<vmem>>, %arg2: memref<100x64xf32, #tpu.memory_space<vmem>>, %arg3: memref<1x64xf32, #tpu.memory_space<vmem>>, %arg4: memref<64x32xf32, #tpu.memory_space<vmem>>, %arg5: memref<1x32xf32, #tpu.memory_space<vmem>>, %arg6: memref<32x2xf32, #tpu.memory_space<vmem>>, %arg7: memref<1x2xf32, #tpu.memory_space<vmem>>, %arg8: memref<8x2xf32, #tpu.memory_space<vmem>>) attributes {dimension_semantics = [#tpu.dimension_semantics<parallel>], iteration_bounds = array<i64: 1>, scalar_prefetch = 0 : i64, scratch_operands = 0 : i64, tpu.core_type = #tpu.core_type<tc>, window_params = [{transform_indices = @transform_0, window_bounds = array<i64: 8, 100>}, {pipeline_mode = #tpu.pipeline_mode<synchronous>, transform_indices = @transform_1, window_bounds = array<i64: 100, 64>}, {pipeline_mode = #tpu.pipeline_mode<synchronous>, transform_indices = @transform_2, window_bounds = array<i64: 1, 64>}, {pipeline_mode = #tpu.pipeline_mode<synchronous>, transform_indices = @transform_3, window_bounds = array<i64: 64, 32>}, {pipeline_mode = #tpu.pipeline_mode<synchronous>, transform_indices = @transform_4, window_bounds = array<i64: 1, 32>}, {pipeline_mode = #tpu.pipeline_mode<synchronous>, transform_indices = @transform_5, window_bounds = array<i64: 32, 2>}, {pipeline_mode = #tpu.pipeline_mode<synchronous>, transform_indices = @transform_6, window_bounds = array<i64: 1, 2>}, {transform_indices = @transform_7, window_bounds = array<i64: 8, 2>}]} {
    %c0 = arith.constant 0 : index
    %c0_0 = arith.constant 0 : index
    %0 = vector.load %arg1[%c0, %c0_0] : memref<8x100xf32, #tpu.memory_space<vmem>>, vector<8x100xf32>
    %c0_1 = arith.constant 0 : index
    %c0_2 = arith.constant 0 : index
    %1 = vector.load %arg2[%c0_1, %c0_2] : memref<100x64xf32, #tpu.memory_space<vmem>>, vector<100x64xf32>
    %cst = arith.constant dense<0.000000e+00> : vector<8x64xf32>
    %2 = tpu.matmul %0, %1, %cst {dimension_numbers = #tpu.dot_dimension_numbers<[1], [0], [0], [1], [0, 0, 1, 1], [], []>} : vector<8x100xf32>, vector<100x64xf32>, vector<8x64xf32> -> vector<8x64xf32>
    %c0_3 = arith.constant 0 : index
    %c0_4 = arith.constant 0 : index
    %3 = vector.load %arg3[%c0_3, %c0_4] : memref<1x64xf32, #tpu.memory_space<vmem>>, vector<1x64xf32>
    %4 = vector.broadcast %3 : vector<1x64xf32> to vector<8x64xf32>
    %5 = arith.addf %2, %4 : vector<8x64xf32>
    %cst_5 = arith.constant 0.000000e+00 : f32
    %6 = vector.broadcast %cst_5 : f32 to vector<8x64xf32>
    %7 = arith.maximumf %5, %6 : vector<8x64xf32>
    %c0_6 = arith.constant 0 : index
    %c0_7 = arith.constant 0 : index
    %8 = vector.load %arg4[%c0_6, %c0_7] : memref<64x32xf32, #tpu.memory_space<vmem>>, vector<64x32xf32>
    %cst_8 = arith.constant dense<0.000000e+00> : vector<8x32xf32>
    %9 = tpu.matmul %7, %8, %cst_8 {dimension_numbers = #tpu.dot_dimension_numbers<[1], [0], [0], [1], [0, 0, 1, 1], [], []>} : vector<8x64xf32>, vector<64x32xf32>, vector<8x32xf32> -> vector<8x32xf32>
    %c0_9 = arith.constant 0 : index
    %c0_10 = arith.constant 0 : index
    %10 = vector.load %arg5[%c0_9, %c0_10] : memref<1x32xf32, #tpu.memory_space<vmem>>, vector<1x32xf32>
    %11 = vector.broadcast %10 : vector<1x32xf32> to vector<8x32xf32>
    %12 = arith.addf %9, %11 : vector<8x32xf32>
    %cst_11 = arith.constant 0.000000e+00 : f32
    %13 = vector.broadcast %cst_11 : f32 to vector<8x32xf32>
    %14 = arith.maximumf %12, %13 : vector<8x32xf32>
    %c0_12 = arith.constant 0 : index
    %c0_13 = arith.constant 0 : index
    %15 = vector.load %arg6[%c0_12, %c0_13] : memref<32x2xf32, #tpu.memory_space<vmem>>, vector<32x2xf32>
    %cst_14 = arith.constant dense<0.000000e+00> : vector<8x2xf32>
    %16 = tpu.matmul %14, %15, %cst_14 {dimension_numbers = #tpu.dot_dimension_numbers<[1], [0], [0], [1], [0, 0, 1, 1], [], []>} : vector<8x32xf32>, vector<32x2xf32>, vector<8x2xf32> -> vector<8x2xf32>
    %c0_15 = arith.constant 0 : index
    %c0_16 = arith.constant 0 : index
    %17 = vector.load %arg7[%c0_15, %c0_16] : memref<1x2xf32, #tpu.memory_space<vmem>>, vector<1x2xf32>
    %18 = vector.broadcast %17 : vector<1x2xf32> to vector<8x2xf32>
    %19 = arith.addf %16, %18 : vector<8x2xf32>
    %20 = vector.extract_strided_slice %19 {offsets = [0, 0], sizes = [8, 1], strides = [1, 1]} : vector<8x2xf32> to vector<8x1xf32>
    %21 = vector.extract_strided_slice %19 {offsets = [0, 1], sizes = [8, 1], strides = [1, 1]} : vector<8x2xf32> to vector<8x1xf32>
    %22 = arith.subf %20, %21 : vector<8x1xf32>
    %23 = math.absf %22 : vector<8x1xf32>
    %cst_17 = arith.constant 0.000000e+00 : f32
    %24 = vector.broadcast %cst_17 : f32 to vector<8x1xf32>
    %25 = arith.subf %24, %23 : vector<8x1xf32>
    %26 = math.exp %25 : vector<8x1xf32>
    %cst_18 = arith.constant 1.000000e+00 : f32
    %27 = vector.broadcast %cst_18 : f32 to vector<8x1xf32>
    %28 = arith.addf %27, %26 : vector<8x1xf32>
    %cst_19 = arith.constant 1.000000e+00 : f32
    %29 = vector.broadcast %cst_19 : f32 to vector<8x1xf32>
    %30 = arith.divf %29, %28 : vector<8x1xf32>
    %cst_20 = arith.constant 0.000000e+00 : f32
    %31 = vector.broadcast %cst_20 : f32 to vector<8x1xf32>
    %32 = arith.cmpf oge, %22, %31 : vector<8x1xf32>
    %cst_21 = arith.constant 1.000000e+00 : f32
    %33 = vector.broadcast %cst_21 : f32 to vector<8x1xf32>
    %34 = arith.subf %33, %30 : vector<8x1xf32>
    %35 = arith.select %32, %30, %34 : vector<8x1xi1>, vector<8x1xf32>
    %cst_22 = arith.constant 1.000000e+00 : f32
    %36 = vector.broadcast %cst_22 : f32 to vector<8x1xf32>
    %37 = arith.subf %36, %35 : vector<8x1xf32>
    %38 = tpu.concatenate %35, %37 in 1 : vector<8x1xf32>, vector<8x1xf32> -> vector<8x2xf32>
    %c0_23 = arith.constant 0 : index
    %c0_24 = arith.constant 0 : index
    %39 = vector.load %arg8[%c0_23, %c0_24] : memref<8x2xf32, #tpu.memory_space<vmem>>, vector<8x2xf32>
    tpu.vector_store %arg8[%c0_23, %c0_24], %38 {strides = array<i32>} : memref<8x2xf32, #tpu.memory_space<vmem>>, vector<8x2xf32>,
    return
  }
  func.func @transform_0(%arg0: i32) -> (i32, i32) {
    %c0_i32 = arith.constant 0 : i32
    %c0_i32_0 = arith.constant 0 : i32
    return %arg0, %c0_i32 : i32, i32
  }
  func.func @transform_1(%arg0: i32) -> (i32, i32) {
    %c0_i32 = arith.constant 0 : i32
    %c0_i32_0 = arith.constant 0 : i32
    %c0_i32_1 = arith.constant 0 : i32
    return %c0_i32, %c0_i32_0 : i32, i32
  }
  func.func @transform_2(%arg0: i32) -> (i32, i32) {
    %c0_i32 = arith.constant 0 : i32
    %c0_i32_0 = arith.constant 0 : i32
    %c0_i32_1 = arith.constant 0 : i32
    return %c0_i32, %c0_i32_0 : i32, i32
  }
  func.func @transform_3(%arg0: i32) -> (i32, i32) {
    %c0_i32 = arith.constant 0 : i32
    %c0_i32_0 = arith.constant 0 : i32
    %c0_i32_1 = arith.constant 0 : i32
    return %c0_i32, %c0_i32_0 : i32, i32
  }
  func.func @transform_4(%arg0: i32) -> (i32, i32) {
    %c0_i32 = arith.constant 0 : i32
    %c0_i32_0 = arith.constant 0 : i32
    %c0_i32_1 = arith.constant 0 : i32
    return %c0_i32, %c0_i32_0 : i32, i32
  }
  func.func @transform_5(%arg0: i32) -> (i32, i32) {
    %c0_i32 = arith.constant 0 : i32
    %c0_i32_0 = arith.constant 0 : i32
    %c0_i32_1 = arith.constant 0 : i32
    return %c0_i32, %c0_i32_0 : i32, i32
  }
  func.func @transform_6(%arg0: i32) -> (i32, i32) {
    %c0_i32 = arith.constant 0 : i32
    %c0_i32_0 = arith.constant 0 : i32
    %c0_i32_1 = arith.constant 0 : i32
    return %c0_i32, %c0_i32_0 : i32, i32
  }
  func.func @transform_7(%arg0: i32) -> (i32, i32) {
    %c0_i32 = arith.constant 0 : i32
    %c0_i32_0 = arith.constant 0 : i32
    return %arg0, %c0_i32 : i32, i32
  }
}

</mosaic_0001>

<bundles_post_ra>
// kernel: tpu_custom_call.1
= control target key start
LH: loop header
LB: loop body
LE: loop exit
PB: predicated region body
PF: predicated region fallthrough
CT: control target
= control target key end

     0   :  { %v468_v0 = vmov 0.0|0.0   ;;  %vm469_vm0 = vmmov 0   ;;  %v470_v4 = vmov 0.0   ;;  %vm51_vm1 = vcmask 1043456   ;;  %s622_s1 = inlined_call_operand.vmem [shape: f32[100,64], index: 1, kind: input, shape index: {}]   ;;  %s623_s3 = inlined_call_operand.vmem [shape: f32[64,32], index: 3, kind: input, shape index: {}]   ;;  %s624_s0 = inlined_call_operand.vmem [shape: f32[8,100], index: 0, kind: input, shape index: {}]   ;;  %s625_s2 = inlined_call_operand.vmem [shape: f32[1,64], index: 2, kind: input, shape index: {}]   ;;  %s626_s5 = inlined_call_operand.vmem [shape: f32[32,2], index: 5, kind: input, shape index: {}]   ;;  %s627_s4 = inlined_call_operand.vmem [shape: f32[1,32], index: 4, kind: input, shape index: {}]   ;;  %s628_s6 = inlined_call_operand.vmem [shape: f32[1,2], index: 6, kind: input, shape index: {}]   ;;  %s629_s7 = inlined_call_operand.vmem [shape: f32[8,2], index: 7, kind: output, shape index: {}]  }
   0x1   :  { %423 = vmatprep.subr.bf16.mxu0 %v468_v0  ;;  %v27_v1 = vld [vmem:[%s622_s1] sm:$0xff]  ;;  %v28_v2 = vld [vmem:[%s622_s1 + $0x8] sm:$0xff]  ;;  %v29_v3 = vld [vmem:[%s622_s1 + $0x10] sm:$0xff]  ;;  %390 = vmatprep.mubr.msk.f32.mxu0 %vm469_vm0, %v470_v4  ;;  %vm47_vm2 = vcmask 818176   ;;  %vm141_vm3 = vcmask 523264   ;;  %vm227_vm4 = vcmask 261120  }
   0x2   :  { %v424_v5 = vpack.c.bf16 %v28_v2, %v27_v1  ;;  %v30_v6 = vld [vmem:[%s622_s1 + $0x18] sm:$0xff]  ;;  %441 = vmatprep.subr.bf16.mxu1 %v468_v0  ;;  %409 = vmatprep.mubr.msk.f32.mxu1 %vm469_vm0, %v470_v4  ;;  %v31_v8 = vld [vmem:[%s622_s1 + $0x20] sm:$0xff]  ;;  %v32_v9 = vld [vmem:[%s622_s1 + $0x28] sm:$0xff]  ;;  %vm321_vm6 = vcmask 7168   ;;  %vm323_vm7 = vcmask 15360  }
   0x3   :  { %v427_v7 = vpack.c.bf16 %v30_v6, %v29_v3  ;;  %v126_v10 = vld [vmem:[%s623_s3] sm:$0xff]  ;;  %v127_v11 = vld [vmem:[%s623_s3 + $0x8] sm:$0xff]  ;;  %v128_v12 = vld [vmem:[%s623_s3 + $0x10] sm:$0xff]  ;;  %v430_v15 = vpack.c.bf16 %v32_v9, %v31_v8 }
   0x4   :  { %425 = vmatpush3.bf16.msra.mxu0 %v424_v5  ;;  %v129_v13 = vld [vmem:[%s623_s3 + $0x18] sm:$0xff]  ;;  %v442_v14 = vpack.c.bf16 %v127_v11, %v126_v10  ;;  %v33_v16 = vld [vmem:[%s622_s1 + $0x30] sm:$0xff]  ;;  %v130_v19 = vld [vmem:[%s623_s3 + $0x20] sm:$0xff] }
   0x5   :  { %426 = vmatprep.subr.bf16.mxu0 %v468_v0  ;;  %v34_v17 = vld [vmem:[%s622_s1 + $0x38] sm:$0xff]  ;;  %v445_v18 = vpack.c.bf16 %v129_v13, %v128_v12  ;;  %v131_v20 = vld [vmem:[%s623_s3 + $0x28] sm:$0xff]  ;;  %v35_v22 = vld [vmem:[%s622_s1 + $0x40] sm:$0xff] }
   0x6   :  { %443 = vmatpush3.bf16.msra.mxu1 %v442_v14  ;;  %v433_v21 = vpack.c.bf16 %v34_v17, %v33_v16  ;;  %v36_v23 = vld [vmem:[%s622_s1 + $0x48] sm:$0xff]  ;;  %v448_v24 = vpack.c.bf16 %v131_v20, %v130_v19  ;;  %v37_v26 = vld [vmem:[%s622_s1 + $0x50] sm:$0xff]  ;;  %v38_v27 = vld [vmem:[%s622_s1 + $0x58] sm:$0xff] }
   0x7   :  { %444 = vmatprep.subr.bf16.mxu1 %v468_v0  ;;  %v436_v25 = vpack.c.bf16 %v36_v23, %v35_v22  ;;  %v439_v28 = vpack.c.bf16 %v38_v27, %v37_v26  ;;  %v39_v29 = vld [vmem:[%s622_s1 + $0x60] sm:$0xf]  ;;  %v132_v31 = vld [vmem:[%s623_s3 + $0x30] sm:$0xff]  ;;  %v133_v32 = vld [vmem:[%s623_s3 + $0x38] sm:$0xff] }
   0x8   :  { %428 = vmatpush3.bf16.msra.mxu0 %v427_v7  ;;  %v26_v30 = vld [vmem:[%s624_s0] sm:$0xff]  ;;  %v451_v33 = vpack.c.bf16 %v133_v32, %v132_v31  ;;  %v217_v36 = vld [vmem:[%s626_s5 + $0x8] sm:$0xff]  ;;  %v218_v42 = vld [vmem:[%s626_s5 + $0x10] sm:$0xff] }
   0x9   :  { %429 = vmatprep.subr.bf16.mxu0 %v468_v0  ;;  %v329_v34 = vld [vmem:[%s625_s2] ss:$0 sm:$0xff]  ;;  %v219_v43 = vld [vmem:[%s626_s5 + $0x18] sm:$0xff] }
   0xa   :  { %446 = vmatpush3.bf16.msra.mxu1 %v445_v18  ;;  %v216_v35 = vld [vmem:[%s626_s5] sm:$0xff]  ;;  %v457_v44 = vpack.c.bf16 %v219_v43, %v218_v42  ;;  %s471_s5 = smov 127  }
   0xb   :  { %447 = vmatprep.subr.bf16.mxu1 %v468_v0  ;;  %v454_v40 = vpack.c.bf16 %v217_v36, %v216_v35  ;;  %v332_v45 = vld [vmem:[%s627_s4] ss:$0 sm:$0xff]  ;;  %s472_s4 = smov 1  }
   0xc   :  { %431 = vmatpush3.bf16.msra.mxu0 %v430_v15  ;;  %v334_v50 = vld [vmem:[%s628_s6] ss:$0 sm:$0xff] }
   0xd   :  { %432 = vmatprep.subr.bf16.mxu0 %v468_v0 }
   0xe   :  { %449 = vmatpush3.bf16.msra.mxu1 %v448_v24 }
   0xf   :  { %450 = vmatprep.subr.bf16.mxu1 %v468_v0 }
  0x10   :  { %434 = vmatpush3.bf16.msra.mxu0 %v433_v21 }
  0x11   :  { %435 = vmatprep.subr.bf16.mxu0 %v468_v0 }
  0x12   :  { %452 = vmatpush3.bf16.msra.mxu1 %v451_v33 }
  0x13   :  { %453 = vmatprep.subr.bf16.mxu1 %v468_v0 }
  0x14   :  { %437 = vmatpush3.bf16.msra.mxu0 %v436_v25 }
  0x15   :  { %438 = vmatprep.subr.bf16.mxu0 %v468_v0 }
  0x18   :  { %440 = vmatpush3.bf16.msra.mxu0 %v439_v28 }
  0x19   :  { %388 = vmatprep.subr.mxu0 %v470_v4 }
  0x1c   :  { %389 = vmatpush3.msk.msra.mxu0 %vm51_vm1, %v39_v29 }
  0x1d   :  { %391 = vmatmul.mubr.msk.f32.vlgmr.msra.gmra.mrb[0].mxu0 %vm47_vm2, %v26_v30 }
  0xf0   :  { %v121_v37 = vpop.f32.mrb[0].mxu0 }
  0xf1   :  { %v122_v38 = vadd.f32 %v329_v34, %v121_v37  ;;  %v392_v39 = vpop.f32.mrb[1].mxu0 }
  0xf3   :  { %v125_v41 = vmax.f32 %v122_v38, 0.0 }
  0xf5   :  { %410 = vmatmul.mubr.msk.f32.vlgmr.msra.gmra.mrb[0].mxu1 %vm141_vm3, %v125_v41 }
  0xf6   :  { %455 = vmatpush3.bf16.msra.mxu1 %v454_v40  ;;  %420 = vmatprep.mubr.msk.f32.mxu1 %vm469_vm0, %v470_v4 }
  0xf7   :  { %456 = vmatprep.subr.bf16.mxu1 %v468_v0 }
  0xfa   :  { %458 = vmatpush3.bf16.msra.mxu1 %v457_v44 }
 0x1c8   :  { %v211_v46 = vpop.f32.mrb[0].mxu1 }
 0x1c9   :  { %v212_v47 = vadd.f32 %v332_v45, %v211_v46  ;;  %v411_v48 = vpop.f32.mrb[1].mxu1 }
 0x1cb   :  { %v215_v49 = vmax.f32 %v212_v47, 0.0 }
 0x1cd   :  { %421 = vmatmul.mubr.msk.f32.vlgmr.msra.gmra.mrb[2].mxu1 %vm227_vm4, %v215_v49 }
 0x2a0   :  { %v297_v51 = vpop.f32.mrb[2].mxu1 }
 0x2a1   :  { %v298_v52 = vadd.f32 %v334_v50, %v297_v51  ;;  %v422_v53 = vpop.f32.mrb[3].mxu1 }
 0x2a3   :  { %302 = vrot.lane.b32.xlu0 %v298_v52, %s471_s5 }
 0x315   :  { %v303_v54 = vpop.permute.xlu0 %302 }
 0x316   :  { %v305_v55 = vsub.f32 %v298_v52, %v303_v54 }
 0x318   :  { %v306_v56 = vand.u32 2147483647, %v305_v55  ;;  %vm313_vm5 = vcmp.ge.f32.partialorder %v305_v55, 0.0 }
 0x31a   :  { %v307_v57 = vsub.f32 0.0, %v306_v56 }
 0x31c   :  { %v308_v58 = vmul.f32 1.442695, %v307_v57 }
 0x31e   :  { %464 = vpow2.f32 %v308_v58 }
 0x328   :  { %v465_v59 = vpop.eup %464 }
 0x329   :  { %v310_v60 = vadd.f32 1.0, %v465_v59 }
 0x32b   :  { %466 = vrcp.f32 %v310_v60 }
 0x335   :  { %v467_v61 = vpop.eup %466 }
 0x336   :  { %v314_v62 = vsub.f32 1.0, %v467_v61 }
 0x338   :  { %v315_v63 = vsel %vm313_vm5, %v467_v61, %v314_v62 }
 0x339   :  { %v316_v0 = vsub.f32 1.0, %v315_v63 }
 0x33b   :  { %318 = vrot.lane.b32.xlu0 %v316_v0, %s472_s4 }
 0x3ad   :  { %v319_v1 = vpop.permute.xlu0 %318 }
 0x3ae   :  { %v322_v2 = vsel %vm321_vm6, %v315_v63, %v319_v1 }
 0x3af   :  { %324 = vst.msk [vmem:[%s629_s7] sm:$0xff] %vm323_vm7, %v322_v2 }

</bundles_post_ra>
